<compile_context>
chip_gen: v6e
topology: v6e:2x2x1
jax: 0.10.0
libtpu: 0.0.40
codegen_flags: <defaults>
</compile_context>

<pallas_src>
import jax
import jax.numpy as jnp
from jax.experimental import pallas as pl
from jax.experimental.pallas import tpu as pltpu


def _pair(v):
    if isinstance(v, (tuple, list)):
        return (v[0], v[0]) if len(v) == 1 else (v[0], v[1])
    return (v, v)


def _largest_divisor_leq(n, cap):
    cap = max(1, min(n, cap))
    for d in range(cap, 0, -1):
        if n % d == 0:
            return d
    return 1


def _build_kernel(*, C_BLK, C_INNER, KH, KW, ph, pw, OH, OW, OHf, OWf,
                  has_pad, strided):
    """Builds the depthwise-conv kernel for one (batch, channel-block) step."""

    def kernel(*refs):
        i = 0
        x_ref = refs[i]; i += 1            # (C_BLK, H, W)   input slab
        w_ref = refs[i]; i += 1            # (C, KH, KW)     resident weight
        if strided:
            rsel_ref = refs[i]; i += 1     # (OH, OHf)       resident row-select
            csel_ref = refs[i]; i += 1     # (OWf, OW)       resident col-select
        o_ref = refs[i]; i += 1            # (C_BLK, OH, OW) output slab
        xp_ref = refs[i] if has_pad else None   # (C_BLK, Hp, Wp) padded scratch

        _, H, W = x_ref.shape
        cb = pl.program_id(1)
        # Per-block taps, loaded once from the resident weight.
        w_blk = w_ref[pl.ds(cb * C_BLK, C_BLK)].astype(jnp.float32)  # (C_BLK,KH,KW)

        # ---- padded source: zero only the border, then copy the interior ----
        if has_pad:
            Hp = H + 2 * ph
            Wp = W + 2 * pw
            zdt = xp_ref.dtype
            if ph > 0:
                xp_ref[pl.ds(0, C_BLK), pl.ds(0, ph), pl.ds(0, Wp)] = (
                    jnp.zeros((C_BLK, ph, Wp), zdt))
                xp_ref[pl.ds(0, C_BLK), pl.ds(Hp - ph, ph), pl.ds(0, Wp)] = (
                    jnp.zeros((C_BLK, ph, Wp), zdt))
            if pw > 0:
                xp_ref[pl.ds(0, C_BLK), pl.ds(0, Hp), pl.ds(0, pw)] = (
                    jnp.zeros((C_BLK, Hp, pw), zdt))
                xp_ref[pl.ds(0, C_BLK), pl.ds(0, Hp), pl.ds(Wp - pw, pw)] = (
                    jnp.zeros((C_BLK, Hp, pw), zdt))
            xp_ref[pl.ds(0, C_BLK), pl.ds(ph, H), pl.ds(pw, W)] = x_ref[...]
            src = xp_ref
        else:
            src = x_ref

        if strided:
            rsel = rsel_ref[...]
            csel = csel_ref[...]

        # ---- tap loop: vreg accumulation, unit-stride offset slices ---------
        for c0 in range(0, C_BLK, C_INNER):
            acc = jnp.zeros((C_INNER, OHf, OWf), jnp.float32)
            for kh in range(KH):                      # KH*KW statically unrolled
                for kw in range(KW):
                    patch = src[pl.ds(c0, C_INNER), pl.ds(kh, OHf), pl.ds(kw, OWf)]
                    tap = w_blk[c0:c0 + C_INNER, kh:kh + 1, kw:kw + 1]  # (Ci,1,1)
                    acc = acc + patch.astype(jnp.float32) * tap
            if not strided:
                # OHf == OH, OWf == OW when stride == 1.
                o_ref[pl.ds(c0, C_INNER)] = acc.astype(o_ref.dtype)
            else:
                # Subsample rows (oh*sh) / cols (ow*sw) with resident one-hot
                # selection matrices (proven-safe lowering path).
                for ci in range(C_INNER):
                    sel = jnp.dot(rsel, acc[ci],
                                  preferred_element_type=jnp.float32)
                    sel = jnp.dot(sel, csel,
                                  preferred_element_type=jnp.float32)
                    o_ref[c0 + ci] = sel.astype(o_ref.dtype)

    return kernel


def adaptive_depthwise_conv2d(x_nchw, weight, stride=1, padding=0):
    """Forward of AdaptiveDepthwiseConv2d (depthwise conv, no bias).

    x_nchw : (N, C, H, W)
    weight : (C, 1, KH, KW)
    """
    N, C, H, W = x_nchw.shape
    Cw, one, KH, KW = weight.shape
    if Cw != C or one != 1:
        raise ValueError("depthwise weight must have shape (C, 1, KH, KW)")
    sh, sw = _pair(stride)
    ph, pw = _pair(padding)
    Hp, Wp = H + 2 * ph, W + 2 * pw
    OH = (Hp - KH) // sh + 1
    OW = (Wp - KW) // sw + 1
    OHf = Hp - KH + 1            # stride-1 resolution used inside the kernel
    OWf = Wp - KW + 1
    has_pad = (ph > 0) or (pw > 0)
    strided = (sh > 1) or (sw > 1)

    itemsize = jnp.dtype(x_nchw.dtype).itemsize
    w_itemsize = jnp.dtype(weight.dtype).itemsize

    # --- channel block: large contiguous NCHW DMA slabs, fewer grid steps ---
    cap = max(1, (4 * 1024 * 1024) // max(1, H * W * itemsize))
    if strided:
        cap = min(cap, 16)       # bounds the per-channel selection-matmul unroll
    C_BLK = _largest_divisor_leq(C, cap)
    # Keep at least 2 grid steps so both v7x TensorCores get work.
    if N * (C // C_BLK) < 2 and C_BLK > 1:
        for d in range(C_BLK - 1, 0, -1):
            if C % d == 0 and (C // d) >= 2:
                C_BLK = d
                break

    # --- inner channel chunk: bound live f32 accumulator vregs --------------
    vregs_per_chan = ((OHf + 7) // 8) * ((OWf + 127) // 128)
    C_INNER = _largest_divisor_leq(C_BLK, max(1, 24 // max(1, vregs_per_chan)))

    kernel = _build_kernel(C_BLK=C_BLK, C_INNER=C_INNER, KH=KH, KW=KW,
                           ph=ph, pw=pw, OH=OH, OW=OW, OHf=OHf, OWf=OWf,
                           has_pad=has_pad, strided=strided)

    # Weight reshaped to (C, KH, KW) and kept VMEM-resident (constant index_map).
    w_prep = jnp.reshape(weight, (C, KH, KW))

    in_specs = [
        pl.BlockSpec((None, C_BLK, H, W), lambda n, c: (n, c, 0, 0)),
        pl.BlockSpec((C, KH, KW), lambda n, c: (0, 0, 0)),
    ]
    args = [x_nchw, w_prep]
    if strided:
        rsel = (jnp.arange(OHf)[None, :] == sh * jnp.arange(OH)[:, None]
                ).astype(jnp.float32)                       # (OH, OHf)
        csel = (jnp.arange(OWf)[:, None] == sw * jnp.arange(OW)[None, :]
                ).astype(jnp.float32)                       # (OWf, OW)
        in_specs += [pl.BlockSpec((OH, OHf), lambda n, c: (0, 0)),
                     pl.BlockSpec((OWf, OW), lambda n, c: (0, 0))]
        args += [rsel, csel]

    scratch_shapes = []
    if has_pad:
        scratch_shapes.append(pltpu.VMEM((C_BLK, Hp, Wp), x_nchw.dtype))

    # --- VMEM budget: always set explicitly, capped by physical capacity ----
    est = (2 * C_BLK * (H * W + OH * OW) * itemsize            # 2x-buffered blocks
           + 2 * C * KH * KW * w_itemsize                      # resident weight
           + (C_BLK * Hp * Wp * itemsize if has_pad else 0)    # padded scratch
           + (2 * (OH * OHf + OWf * OW) * 4 if strided else 0))
    try:
        cap_bytes = int(getattr(pltpu.get_tpu_info(), "vmem_capacity_bytes",
                                64 * 1024 * 1024))
    except Exception:
        cap_bytes = 64 * 1024 * 1024                           # v7x-safe fallback
    vmem_limit = int(min(0.7 * cap_bytes, max(32 * 1024 * 1024, 2 * est)))

    return pl.pallas_call(
        kernel,
        out_shape=jax.ShapeDtypeStruct((N, C, OH, OW), x_nchw.dtype),
        grid_spec=pltpu.PrefetchScalarGridSpec(
            num_scalar_prefetch=0,
            grid=(N, C // C_BLK),
            in_specs=in_specs,
            out_specs=pl.BlockSpec((None, C_BLK, OH, OW),
                                   lambda n, c: (n, c, 0, 0)),
            scratch_shapes=scratch_shapes,
        ),
        compiler_params=pltpu.CompilerParams(
            dimension_semantics=("parallel", "parallel"),
            vmem_limit_bytes=vmem_limit),
    )(*args)


def _reference(x_nchw, weight, stride, padding):
    C = x_nchw.shape[1]
    return jax.lax.conv_general_dilated(
        x_nchw, weight,
        window_strides=stride,
        padding=[(padding[0], padding[0]), (padding[1], padding[1])],
        dimension_numbers=("NCHW", "OIHW", "NCHW"),
        feature_group_count=C)


if __name__ == "__main__":
    key = jax.random.PRNGKey(0)
    kx, kw = jax.random.split(key)

    N, C, H, W = 2, 4, 16, 16
    KH = KW = 3

    x = jax.random.normal(kx, (N, C, H, W), dtype=jnp.float32)
    # The "adaptive" weight is supplied externally in the torch module; use a
    # deterministic synthetic one with the torch depthwise shape (C,1,KH,KW).
    weight = jax.random.normal(kw, (C, 1, KH, KW), dtype=jnp.float32) * 0.1

    ok = True
    for stride, padding in [((1, 1), (1, 1)), ((2, 2), (1, 1)), ((1, 1), (0, 0))]:
        out = adaptive_depthwise_conv2d(x, weight, stride=stride, padding=padding)
        out = jax.block_until_ready(out)
        ref = _reference(x, weight, stride, padding)
        if out.shape != ref.shape or not jnp.allclose(out, ref, atol=1e-4, rtol=1e-4):
            ok = False
            print(f"MISMATCH stride={stride} padding={padding} "
                  f"max_err={float(jnp.max(jnp.abs(out - ref)))}")

    if ok:
        print("KERNEL_OK")
</pallas_src>

<mosaic_0001>
module attributes {stable_mosaic.version = 11 : i64} {
  func.func @kernel(%arg0: i32, %arg1: i32, %arg2: memref<1x4x16x16xf32, #tpu.memory_space<vmem>>, %arg3: memref<4x3x3xf32, #tpu.memory_space<vmem>>, %arg4: memref<1x4x16x16xf32, #tpu.memory_space<vmem>>, %arg5: memref<4x18x18xf32, #tpu.memory_space<vmem>>) attributes {dimension_semantics = [#tpu.dimension_semantics<parallel>, #tpu.dimension_semantics<parallel>], iteration_bounds = array<i64: 2, 1>, scalar_prefetch = 0 : i64, scratch_operands = 1 : i64, tpu.core_type = #tpu.core_type<tc>, window_params = [{transform_indices = @transform_0, window_bounds = array<i64: 1, 4, 16, 16>}, {pipeline_mode = #tpu.pipeline_mode<synchronous>, transform_indices = @transform_1, window_bounds = array<i64: 4, 3, 3>}, {transform_indices = @transform_2, window_bounds = array<i64: 1, 4, 16, 16>}]} {
    %c4_i32 = arith.constant 4 : i32
    %0 = arith.muli %arg1, %c4_i32 : i32
    %1 = arith.index_cast %0 : i32 to index
    %c0 = arith.constant 0 : index
    %c0_0 = arith.constant 0 : index
    %2 = vector.load %arg3[%1, %c0, %c0_0] : memref<4x3x3xf32, #tpu.memory_space<vmem>>, vector<4x3x3xf32>
    %cst = arith.constant 0.000000e+00 : f32
    %3 = vector.broadcast %cst : f32 to vector<4x1x18xf32>
    %c0_1 = arith.constant 0 : index
    %c0_2 = arith.constant 0 : index
    %c0_3 = arith.constant 0 : index
    %4 = vector.load %arg5[%c0_1, %c0_2, %c0_3] : memref<4x18x18xf32, #tpu.memory_space<vmem>>, vector<4x1x18xf32>
    tpu.vector_store %arg5[%c0_1, %c0_2, %c0_3], %3 {strides = array<i32>} : memref<4x18x18xf32, #tpu.memory_space<vmem>>, vector<4x1x18xf32>,
    %cst_4 = arith.constant 0.000000e+00 : f32
    %5 = vector.broadcast %cst_4 : f32 to vector<4x1x18xf32>
    %c0_5 = arith.constant 0 : index
    %c17 = arith.constant 17 : index
    %c0_6 = arith.constant 0 : index
    %6 = vector.load %arg5[%c0_5, %c17, %c0_6] : memref<4x18x18xf32, #tpu.memory_space<vmem>>, vector<4x1x18xf32>
    tpu.vector_store %arg5[%c0_5, %c17, %c0_6], %5 {strides = array<i32>} : memref<4x18x18xf32, #tpu.memory_space<vmem>>, vector<4x1x18xf32>,
    %cst_7 = arith.constant 0.000000e+00 : f32
    %7 = vector.broadcast %cst_7 : f32 to vector<4x18x1xf32>
    %c0_8 = arith.constant 0 : index
    %c0_9 = arith.constant 0 : index
    %c0_10 = arith.constant 0 : index
    %8 = vector.load %arg5[%c0_8, %c0_9, %c0_10] : memref<4x18x18xf32, #tpu.memory_space<vmem>>, vector<4x18x1xf32>
    tpu.vector_store %arg5[%c0_8, %c0_9, %c0_10], %7 {strides = array<i32>} : memref<4x18x18xf32, #tpu.memory_space<vmem>>, vector<4x18x1xf32>,
    %cst_11 = arith.constant 0.000000e+00 : f32
    %9 = vector.broadcast %cst_11 : f32 to vector<4x18x1xf32>
    %c0_12 = arith.constant 0 : index
    %c0_13 = arith.constant 0 : index
    %c17_14 = arith.constant 17 : index
    %10 = vector.load %arg5[%c0_12, %c0_13, %c17_14] : memref<4x18x18xf32, #tpu.memory_space<vmem>>, vector<4x18x1xf32>
    tpu.vector_store %arg5[%c0_12, %c0_13, %c17_14], %9 {strides = array<i32>} : memref<4x18x18xf32, #tpu.memory_space<vmem>>, vector<4x18x1xf32>,
    %c0_15 = arith.constant 0 : index
    %c0_16 = arith.constant 0 : index
    %c0_17 = arith.constant 0 : index
    %c0_18 = arith.constant 0 : index
    %11 = vector.load %arg2[%c0_15, %c0_16, %c0_17, %c0_18] : memref<1x4x16x16xf32, #tpu.memory_space<vmem>>, vector<1x4x16x16xf32>
    %12 = vector.shape_cast %11 : vector<1x4x16x16xf32> to vector<4x16x16xf32>
    %c0_19 = arith.constant 0 : index
    %c1 = arith.constant 1 : index
    %c1_20 = arith.constant 1 : index
    %13 = vector.load %arg5[%c0_19, %c1, %c1_20] : memref<4x18x18xf32, #tpu.memory_space<vmem>>, vector<4x16x16xf32>
    tpu.vector_store %arg5[%c0_19, %c1, %c1_20], %12 {strides = array<i32>} : memref<4x18x18xf32, #tpu.memory_space<vmem>>, vector<4x16x16xf32>,
    %cst_21 = arith.constant 0.000000e+00 : f32
    %14 = vector.broadcast %cst_21 : f32 to vector<4x16x16xf32>
    %c0_22 = arith.constant 0 : index
    %c0_23 = arith.constant 0 : index
    %c0_24 = arith.constant 0 : index
    %15 = vector.load %arg5[%c0_22, %c0_23, %c0_24] : memref<4x18x18xf32, #tpu.memory_space<vmem>>, vector<4x16x16xf32>
    %16 = vector.extract_strided_slice %2 {offsets = [0, 0, 0], sizes = [4, 1, 1], strides = [1, 1, 1]} : vector<4x3x3xf32> to vector<4x1x1xf32>
    %17 = vector.broadcast %16 : vector<4x1x1xf32> to vector<4x16x16xf32>
    %18 = arith.mulf %15, %17 : vector<4x16x16xf32>
    %19 = arith.addf %14, %18 : vector<4x16x16xf32>
    %c0_25 = arith.constant 0 : index
    %c0_26 = arith.constant 0 : index
    %c1_27 = arith.constant 1 : index
    %20 = vector.load %arg5[%c0_25, %c0_26, %c1_27] : memref<4x18x18xf32, #tpu.memory_space<vmem>>, vector<4x16x16xf32>
    %21 = vector.extract_strided_slice %2 {offsets = [0, 0, 1], sizes = [4, 1, 1], strides = [1, 1, 1]} : vector<4x3x3xf32> to vector<4x1x1xf32>
    %22 = vector.broadcast %21 : vector<4x1x1xf32> to vector<4x16x16xf32>
    %23 = arith.mulf %20, %22 : vector<4x16x16xf32>
    %24 = arith.addf %19, %23 : vector<4x16x16xf32>
    %c0_28 = arith.constant 0 : index
    %c0_29 = arith.constant 0 : index
    %c2 = arith.constant 2 : index
    %25 = vector.load %arg5[%c0_28, %c0_29, %c2] : memref<4x18x18xf32, #tpu.memory_space<vmem>>, vector<4x16x16xf32>
    %26 = vector.extract_strided_slice %2 {offsets = [0, 0, 2], sizes = [4, 1, 1], strides = [1, 1, 1]} : vector<4x3x3xf32> to vector<4x1x1xf32>
    %27 = vector.broadcast %26 : vector<4x1x1xf32> to vector<4x16x16xf32>
    %28 = arith.mulf %25, %27 : vector<4x16x16xf32>
    %29 = arith.addf %24, %28 : vector<4x16x16xf32>
    %c0_30 = arith.constant 0 : index
    %c1_31 = arith.constant 1 : index
    %c0_32 = arith.constant 0 : index
    %30 = vector.load %arg5[%c0_30, %c1_31, %c0_32] : memref<4x18x18xf32, #tpu.memory_space<vmem>>, vector<4x16x16xf32>
    %31 = vector.extract_strided_slice %2 {offsets = [0, 1, 0], sizes = [4, 1, 1], strides = [1, 1, 1]} : vector<4x3x3xf32> to vector<4x1x1xf32>
    %32 = vector.broadcast %31 : vector<4x1x1xf32> to vector<4x16x16xf32>
    %33 = arith.mulf %30, %32 : vector<4x16x16xf32>
    %34 = arith.addf %29, %33 : vector<4x16x16xf32>
    %c0_33 = arith.constant 0 : index
    %c1_34 = arith.constant 1 : index
    %c1_35 = arith.constant 1 : index
    %35 = vector.load %arg5[%c0_33, %c1_34, %c1_35] : memref<4x18x18xf32, #tpu.memory_space<vmem>>, vector<4x16x16xf32>
    %36 = vector.extract_strided_slice %2 {offsets = [0, 1, 1], sizes = [4, 1, 1], strides = [1, 1, 1]} : vector<4x3x3xf32> to vector<4x1x1xf32>
    %37 = vector.broadcast %36 : vector<4x1x1xf32> to vector<4x16x16xf32>
    %38 = arith.mulf %35, %37 : vector<4x16x16xf32>
    %39 = arith.addf %34, %38 : vector<4x16x16xf32>
    %c0_36 = arith.constant 0 : index
    %c1_37 = arith.constant 1 : index
    %c2_38 = arith.constant 2 : index
    %40 = vector.load %arg5[%c0_36, %c1_37, %c2_38] : memref<4x18x18xf32, #tpu.memory_space<vmem>>, vector<4x16x16xf32>
    %41 = vector.extract_strided_slice %2 {offsets = [0, 1, 2], sizes = [4, 1, 1], strides = [1, 1, 1]} : vector<4x3x3xf32> to vector<4x1x1xf32>
    %42 = vector.broadcast %41 : vector<4x1x1xf32> to vector<4x16x16xf32>
    %43 = arith.mulf %40, %42 : vector<4x16x16xf32>
    %44 = arith.addf %39, %43 : vector<4x16x16xf32>
    %c0_39 = arith.constant 0 : index
    %c2_40 = arith.constant 2 : index
    %c0_41 = arith.constant 0 : index
    %45 = vector.load %arg5[%c0_39, %c2_40, %c0_41] : memref<4x18x18xf32, #tpu.memory_space<vmem>>, vector<4x16x16xf32>
    %46 = vector.extract_strided_slice %2 {offsets = [0, 2, 0], sizes = [4, 1, 1], strides = [1, 1, 1]} : vector<4x3x3xf32> to vector<4x1x1xf32>
    %47 = vector.broadcast %46 : vector<4x1x1xf32> to vector<4x16x16xf32>
    %48 = arith.mulf %45, %47 : vector<4x16x16xf32>
    %49 = arith.addf %44, %48 : vector<4x16x16xf32>
    %c0_42 = arith.constant 0 : index
    %c2_43 = arith.constant 2 : index
    %c1_44 = arith.constant 1 : index
    %50 = vector.load %arg5[%c0_42, %c2_43, %c1_44] : memref<4x18x18xf32, #tpu.memory_space<vmem>>, vector<4x16x16xf32>
    %51 = vector.extract_strided_slice %2 {offsets = [0, 2, 1], sizes = [4, 1, 1], strides = [1, 1, 1]} : vector<4x3x3xf32> to vector<4x1x1xf32>
    %52 = vector.broadcast %51 : vector<4x1x1xf32> to vector<4x16x16xf32>
    %53 = arith.mulf %50, %52 : vector<4x16x16xf32>
    %54 = arith.addf %49, %53 : vector<4x16x16xf32>
    %c0_45 = arith.constant 0 : index
    %c2_46 = arith.constant 2 : index
    %c2_47 = arith.constant 2 : index
    %55 = vector.load %arg5[%c0_45, %c2_46, %c2_47] : memref<4x18x18xf32, #tpu.memory_space<vmem>>, vector<4x16x16xf32>
    %56 = vector.extract_strided_slice %2 {offsets = [0, 2, 2], sizes = [4, 1, 1], strides = [1, 1, 1]} : vector<4x3x3xf32> to vector<4x1x1xf32>
    %57 = vector.broadcast %56 : vector<4x1x1xf32> to vector<4x16x16xf32>
    %58 = arith.mulf %55, %57 : vector<4x16x16xf32>
    %59 = arith.addf %54, %58 : vector<4x16x16xf32>
    %c0_48 = arith.constant 0 : index
    %c0_49 = arith.constant 0 : index
    %c0_50 = arith.constant 0 : index
    %c0_51 = arith.constant 0 : index
    %60 = vector.load %arg4[%c0_48, %c0_49, %c0_50, %c0_51] : memref<1x4x16x16xf32, #tpu.memory_space<vmem>>, vector<1x4x16x16xf32>
    %61 = vector.shape_cast %60 : vector<1x4x16x16xf32> to vector<4x16x16xf32>
    %62 = vector.shape_cast %59 : vector<4x16x16xf32> to vector<1x4x16x16xf32>
    tpu.vector_store %arg4[%c0_48, %c0_49, %c0_50, %c0_51], %62 {strides = array<i32>} : memref<1x4x16x16xf32, #tpu.memory_space<vmem>>, vector<1x4x16x16xf32>,
    return
  }
  func.func @transform_0(%arg0: i32, %arg1: i32) -> (i32, i32, i32, i32) {
    %c0_i32 = arith.constant 0 : i32
    %c0_i32_0 = arith.constant 0 : i32
    %c0_i32_1 = arith.constant 0 : i32
    return %arg0, %arg1, %c0_i32, %c0_i32_0 : i32, i32, i32, i32
  }
  func.func @transform_1(%arg0: i32, %arg1: i32) -> (i32, i32, i32) {
    %c0_i32 = arith.constant 0 : i32
    %c0_i32_0 = arith.constant 0 : i32
    %c0_i32_1 = arith.constant 0 : i32
    %c0_i32_2 = arith.constant 0 : i32
    return %c0_i32, %c0_i32_0, %c0_i32_1 : i32, i32, i32
  }
  func.func @transform_2(%arg0: i32, %arg1: i32) -> (i32, i32, i32, i32) {
    %c0_i32 = arith.constant 0 : i32
    %c0_i32_0 = arith.constant 0 : i32
    %c0_i32_1 = arith.constant 0 : i32
    return %arg0, %arg1, %c0_i32, %c0_i32_0 : i32, i32, i32, i32
  }
}

</mosaic_0001>

<bundles_post_ra>
// kernel: tpu_custom_call.1
= control target key start
LH: loop header
LB: loop body
LE: loop exit
PB: predicated region body
PF: predicated region fallthrough
CT: control target
= control target key end

     0   :  { %7 = vsyncpa [#allocation4], 0  ;;  %s1774_s0 = inlined_call_operand.hbm [shape: f32[2,4,16,16], index: 0, kind: input, shape index: {}]   ;;  %s1775_s1 = inlined_call_operand.vmem [shape: f32[4,3,3], index: 1, kind: input, shape index: {}]   ;;  %s1776_s2 = inlined_call_operand.hbm [shape: f32[2,4,16,16], index: 2, kind: output, shape index: {}]  }
   0x1   :  { %9 = vsyncpa [#allocation4 + $0x1], 0 }
   0x2   :  { %10 = vsyncpa [#allocation5], 0 }
   0x3   :  { %12 = vsyncpa [#allocation5 + $0x1], 0  ;;  %s1213_s9 = smov 0   ;;  %s1215_s10 = smov 0  }
   0x4   :  { %s1217_s11 = smov 0   ;;  %s1219_s12 = smov 0  }
   0x5   :  { %s1221_s13 = smov 0   ;;  %s1223_s14 = smov 0  }
   0x6 LB: > { %s919_s15 = sadd.s32 4294967295, %s1186_s14   ;;  %s920_s16 = sadd.s32 4294967294, %s1186_s14   ;;  %s1186_s14 = sphi %s1223_s14, %s18_s14   ;;  %s1182_s13 = sphi %s1221_s13, %s1787_s13   ;;  %s1178_s12 = sphi %s1219_s12, %s1786_s12   ;;  %s1174_s11 = sphi %s1217_s11, %s1785_s11   ;;  %s1170_s10 = sphi %s1215_s10, %s1784_s10   ;;  %s1166_s9 = sphi %s1213_s9, %s1783_s9  }
   0x7   : > { %s30_s17 = sadd.s32 1, %s1182_s13  ;;  %s39_s18 = sadd.s32 1, %s1174_s11 }
   0x8   : > { %p32_p0 = scmp.ge.s32.totalorder %s30_s17, 2  ;;  %p46_p1 = scmp.ne.s32.totalorder %s1174_s11, %s1170_s10 }
   0x9   : > { %p47_p2 = scmp.eq.s32.totalorder %s1186_s14, 0  ;;  %p52_p3 = scmp.ne.s32.totalorder %s1170_s10, %s1166_s9 }
   0xa   : > { %s1789_s17 = smov (%p32_p0, %s30_s17), 0  ;;  %p53_p5 = scmp.eq.s32.totalorder %s919_s15, 0 }
   0xb   : > { %p1254_p4 = por %p47_p2, %p46_p1  ;;  %s34_s20 = ssub.s32 %s1182_s13, %s1789_s17 }
   0xc   : > { %p99_p6 = scmp.eq.s32.totalorder %s919_s15, 1  ;;  %p37_p7 = scmp.eq.s32.totalorder %s34_s20, 0 }
   0xd   : > { %p1260_p8 = por %p53_p5, %p52_p3  ;;  %p105_p10 = scmp.eq.s32.totalorder %s920_s16, 1 }
   0xe   : > { %p1264_p9 = por %p99_p6, %p46_p1  ;;  %p1020_p13 = scmp.lt.s32.totalorder %s1186_s14, 2 }
   0xf   : > { %s1269_s23 = scalar_select %p37_p7, %s1174_s11, %s39_s18  }
  0x10   : > { %p1271_p11 = por %p105_p10, %p52_p3  ;;  %s128_s25 = sand.u32 1, %s1174_s11  }
  0x11   : > { %s923_s26 = sshll.u32 %s128_s25, 6  ;;  %s934_s27 = sshll.u32 %s1182_s13, 10 }
  0x12   : > { %s141_s30 = scalar_lea.hbm %s1774_s0, %s934_s27  ;;  %s132_s3 = scalar_lea.vmem [#allocation3], %s923_s26 }
  0x13   : > { %s142_s4 = sshll.u32 %s132_s3, 4  ;;  %p1284_p0 = pnand %p1020_p13, %p1254_p4  ;;  %s143_s4 = int_to_ptr.vmem [resolvable:$true] %s142_s4 }
  0x14   : > { %p926_p1 = scmp.ge.s32.totalorder %s1186_s14, 1  ;;  %s129_s6 = scalar_lea.sflag [#allocation4], %s128_s25 }
  0x15   : > { %p1080_p2 = pneg %p1284_p0  ;;  %s1091_s7 = scalar_lea.vmem %s143_s4, 1024 }
  0x16   : > { %p1092_p3 = scmp.ne.s32.totalorder %s143_s4, %s1091_s7  ;;  %s1188_s8 = smov [#allocation3]  }
  0x17   : > { %s1096_s15 = sshll.u32 %s1188_s8, 4  ;;  %s1097_s15 = int_to_ptr.vmem [resolvable:$false] %s1096_s15 }
  0x18   : > { %p1094_p5 = pnand %p1092_p3, %p1080_p2  ;;  %s1098_s16 = scalar_lea.vmem %s1097_s15, 2048 }
  0x19   : > { %p1099_p7 = scmp.lt.s32.totalorder %s143_s4, %s1097_s15  ;;  %p1100_p10 = scmp.lt.s32.totalorder %s1098_s16, %s1091_s7 }
  0x1a   : > { %p1095_p6 = pneg %p1094_p5 }
  0x1b   : > { %p1101_p12 = por %p1100_p10, %p1099_p7 }
  0x1d   : > { %p1102_p4 = pnand %p1101_p12, %p1095_p6 }
  0x1f   : > { %1105 = shalt.err (!%p1102_p4)
}
  0x20   : > { %s1189_s18 = smov 128   ;;  %s1190_s19 = smov 8  }
  0x21   : > { %1015 = dma.hbm_to_vmem [thread:$0]  (!%p1284_p0), %s141_s30, 1024, %s143_s4, %s129_s6, %s1189_s18, %s1189_s18, %s1190_s19  }
  0x22   : > { %p150_p13 = scmp.lt.s32.totalorder %s1186_s14, 3 }
  0x24   : > { %p151_p2 = pnand %p926_p1, %p150_p13 }
  0x25   : > { %s1297_s20 = sand.u32 (!%p151_p2), 1, %s1170_s10  }
  0x26   : > { %154 = sbr.rel (%p151_p2) target bundleno = 443 (0x1bb), region = 28  ;;  %s927_s25 = sshll.u32 (!%p151_p2), %s1297_s20, 6 }
  0x27   : > { %s157_s26 = scalar_lea.sflag (!%p151_p2), [#allocation4], %s1297_s20  ;;  %s1303_s27 = scalar_lea.vmem (!%p151_p2), [#allocation3], %s927_s25 }
  0x2b   : > { %1157 = dma.done.wait (%p1260_p8), %s157_s26, 1024  }
  0x2c   : > { %1159 = vsyncadd (%p1260_p8), %s157_s26, 4294966272  ;;  %v188_v0 = vld [vmem:[%s1775_s1 + $0x8] sm:$0x7]  ;;  %v186_v1 = vld [vmem:[%s1775_s1] sm:$0x7]  ;;  %s1191_s4 = smov 127  }
  0x2d   : > { %320 = vrot.lane.b32.xlu1 %v188_v0, %s1191_s4  ;;  %316 = vrot.lane.b32.xlu0 %v186_v1, %s1191_s4  ;;  %v187_v2 = vld [vmem:[%s1775_s1 + $0x4] sm:$0x7]  ;;  %936 = vpush %v186_v1  ;;  %v189_v3 = vld [vmem:[%s1775_s1 + $0xc] sm:$0x7]  ;;  %s1192_s8 = smov 126   ;;  %v1331_v5 = vrot.slane %v186_v1, 1 }
  0x2e   : > { %938 = vpush %v187_v2  ;;  %v1329_v4 = vrot.slane %v187_v2, 1  ;;  %v1337_v6 = vrot.slane %v189_v3, 1  ;;  %v1339_v7 = vrot.slane %v188_v0, 1  ;;  %v1353_v8 = vrot.slane %v187_v2, 2  ;;  %v228_v13 = vld [vmem:[%s1303_s27 + $0x8] sm:$0xff]  ;;  %v227_v14 = vld [vmem:[%s1303_s27] sm:$0xff] }
  0x2f   : > { %940 = vpush %v188_v0  ;;  %v1355_v9 = vrot.slane %v186_v1, 2  ;;  %v1357_v10 = vrot.slane %v189_v3, 2  ;;  %v1359_v11 = vrot.slane %v188_v0, 2  ;;  %vm190_vm0 = vcmask 139264   ;;  %s1194_s15 = smov 1   ;;  %v230_v15 = vld [vmem:[%s1303_s27 + $0x18] sm:$0xff] }
  0x30   : > { %942 = vpush %v189_v3  ;;  %vm199_vm1 = vcmask 7168   ;;  %vm202_vm2 = vcmask 1024   ;;  %v1193_v12 = vmov 0.0   ;;  %vm213_vm3 = vcmask 146568   ;;  %v229_v16 = vld [vmem:[%s1303_s27 + $0x10] sm:$0xff]  ;;  %v232_v17 = vld [vmem:[%s1303_s27 + $0x28] sm:$0xff] }
  0x31   : > { %322 = vrot.lane.b32.xlu1 %v189_v3, %s1191_s4  ;;  %318 = vrot.lane.b32.xlu0 %v187_v2, %s1191_s4  ;;  %195 = vst.msk [vmem:[#allocation2 + $0x11] sm:$0x1] %vm190_vm0, %v1193_v12  ;;  %vm216_vm4 = vcmask 140424   ;;  %191 = vst.msk [vmem:[#allocation2] sm:$0x1] %vm190_vm0, %v1193_v12  ;;  %v231_v18 = vld [vmem:[%s1303_s27 + $0x20] sm:$0xff] }
  0x32   : > { %201 = vst.msk [vmem:[#allocation2 + $0x8] sm:$0xff] %vm199_vm1, %v1193_v12  ;;  %205 = vst.msk [vmem:[#allocation2 + $0x20] sm:$0xff] %vm199_vm1, %v1193_v12  ;;  %v234_v19 = vld [vmem:[%s1303_s27 + $0x38] sm:$0xff]  ;;  %v233_v20 = vld [vmem:[%s1303_s27 + $0x30] sm:$0xff]  ;;  %vm267_vm5 = vcmask 138248   ;;  %vm804_vm6 = vcmask 130048  }
  0x33   : > { %192 = vst.msk [vmem:[#allocation2 + $0x18] sm:$0x1] %vm190_vm0, %v1193_v12  ;;  %193 = vst.msk [vmem:[#allocation2 + $0x30] sm:$0x1] %vm190_vm0, %v1193_v12 }
  0x34   : > { %194 = vst.msk [vmem:[#allocation2 + $0x48] sm:$0x1] %vm190_vm0, %v1193_v12  ;;  %196 = vst.msk [vmem:[#allocation2 + $0x29] sm:$0x1] %vm190_vm0, %v1193_v12 }
  0x35   : > { %386 = vrot.lane.b32.xlu1 %v187_v2, %s1192_s8  ;;  %384 = vrot.lane.b32.xlu0 %v186_v1, %s1192_s8  ;;  %197 = vst.msk [vmem:[#allocation2 + $0x41] sm:$0x1] %vm190_vm0, %v1193_v12  ;;  %198 = vst.msk [vmem:[#allocation2 + $0x59] sm:$0x1] %vm190_vm0, %v1193_v12 }
  0x36   : > { %208 = vst.msk [vmem:[#allocation2 + $0x38] sm:$0xff] %vm199_vm1, %v1193_v12  ;;  %211 = vst.msk [vmem:[#allocation2 + $0x50] sm:$0xff] %vm199_vm1, %v1193_v12 }
  0x37   : > { %203 = vst.msk [vmem:[#allocation2 + $0x10] sm:$0x3] %vm202_vm2, %v1193_v12  ;;  %206 = vst.msk [vmem:[#allocation2 + $0x28] sm:$0x3] %vm202_vm2, %v1193_v12 }
  0x38   : > { %215 = vst.msk [vmem:[#allocation2 + $0x8] sm:$0xff] %vm213_vm3, %v1193_v12  ;;  %219 = vst.msk [vmem:[#allocation2 + $0x20] sm:$0xff] %vm213_vm3, %v1193_v12 }
  0x39   : > { %390 = vrot.lane.b32.xlu1 %v189_v3, %s1192_s8  ;;  %388 = vrot.lane.b32.xlu0 %v188_v0, %s1192_s8  ;;  %200 = vst.msk [vmem:[#allocation2] sm:$0xff] %vm199_vm1, %v1193_v12  ;;  %204 = vst.msk [vmem:[#allocation2 + $0x18] sm:$0xff] %vm199_vm1, %v1193_v12 }
  0x3a   : > { %207 = vst.msk [vmem:[#allocation2 + $0x30] sm:$0xff] %vm199_vm1, %v1193_v12  ;;  %210 = vst.msk [vmem:[#allocation2 + $0x48] sm:$0xff] %vm199_vm1, %v1193_v12 }
  0x3b   : > { %209 = vst.msk [vmem:[#allocation2 + $0x40] sm:$0x3] %vm202_vm2, %v1193_v12  ;;  %212 = vst.msk [vmem:[#allocation2 + $0x58] sm:$0x3] %vm202_vm2, %v1193_v12 }
  0x3c   : > { %222 = vst.msk [vmem:[#allocation2 + $0x38] sm:$0xff] %vm213_vm3, %v1193_v12  ;;  %225 = vst.msk [vmem:[#allocation2 + $0x50] sm:$0xff] %vm213_vm3, %v1193_v12 }
  0x3d   : > { %494 = vrot.lane.b32.xlu1 %v1329_v4, %s1191_s4  ;;  %492 = vrot.lane.b32.xlu0 %v1331_v5, %s1191_s4  ;;  %217 = vst.msk [vmem:[#allocation2 + $0x10] sm:$0x3] %vm216_vm4, %v1193_v12  ;;  %220 = vst.msk [vmem:[#allocation2 + $0x28] sm:$0x3] %vm216_vm4, %v1193_v12 }
  0x3e   : > { %214 = vst.msk [vmem:[#allocation2] sm:$0xff] %vm213_vm3, %v1193_v12  ;;  %218 = vst.msk [vmem:[#allocation2 + $0x18] sm:$0xff] %vm213_vm3, %v1193_v12 }
  0x3f   : > { %221 = vst.msk [vmem:[#allocation2 + $0x30] sm:$0xff] %vm213_vm3, %v1193_v12  ;;  %224 = vst.msk [vmem:[#allocation2 + $0x48] sm:$0xff] %vm213_vm3, %v1193_v12 }
  0x40   : > { %223 = vst.msk [vmem:[#allocation2 + $0x40] sm:$0x3] %vm216_vm4, %v1193_v12  ;;  %226 = vst.msk [vmem:[#allocation2 + $0x58] sm:$0x3] %vm216_vm4, %v1193_v12 }
  0x41   : > { %498 = vrot.lane.b32.xlu1 %v1337_v6, %s1191_s4  ;;  %496 = vrot.lane.b32.xlu0 %v1339_v7, %s1191_s4 }
  0x45   : > { %562 = vrot.lane.b32.xlu1 %v1329_v4, %s1192_s8  ;;  %560 = vrot.lane.b32.xlu0 %v1331_v5, %s1192_s8 }
  0x49   : > { %566 = vrot.lane.b32.xlu1 %v1337_v6, %s1192_s8  ;;  %564 = vrot.lane.b32.xlu0 %v1339_v7, %s1192_s8 }
  0x4d   : > { %670 = vrot.lane.b32.xlu1 %v1353_v8, %s1191_s4  ;;  %668 = vrot.lane.b32.xlu0 %v1355_v9, %s1191_s4 }
  0x51   : > { %674 = vrot.lane.b32.xlu1 %v1357_v10, %s1191_s4  ;;  %672 = vrot.lane.b32.xlu0 %v1359_v11, %s1191_s4 }
  0x55   : > { %738 = vrot.lane.b32.xlu1 %v1353_v8, %s1192_s8  ;;  %736 = vrot.lane.b32.xlu0 %v1355_v9, %s1192_s8 }
  0x59   : > { %742 = vrot.lane.b32.xlu1 %v1357_v10, %s1192_s8  ;;  %740 = vrot.lane.b32.xlu0 %v1359_v11, %s1192_s8 }
  0x5d   : > { %245 = vrot.lane.b32.xlu1 %v228_v13, %s1194_s15  ;;  %243 = vrot.lane.b32.xlu0 %v227_v14, %s1194_s15 }
  0x5e   : > { %s937_s16 = spop %936 }
  0x5f   : > { %s1417_s18 = spop %938  ;;  %v286_v49 = vstv %s937_s16 }
  0x60   : > { %s1421_s19 = spop %940  ;;  %v290_v0 = vstv %s1417_s18 }
  0x61   : > { %249 = vrot.lane.b32.xlu1 %v230_v15, %s1194_s15  ;;  %247 = vrot.lane.b32.xlu0 %v229_v16, %s1194_s15  ;;  %s1423_s26 = spop %942 }
  0x65   : > { %253 = vrot.lane.b32.xlu1 %v232_v17, %s1194_s15  ;;  %251 = vrot.lane.b32.xlu0 %v231_v18, %s1194_s15 }
  0x69   : > { %257 = vrot.lane.b32.xlu1 %v234_v19, %s1194_s15  ;;  %255 = vrot.lane.b32.xlu0 %v233_v20, %s1194_s15 }
  0x9f   : > { %v321_v21 = vpop.permute.xlu1 %320  ;;  %v317_v22 = vpop.permute.xlu0 %316 }
  0xa0   : > { %944 = vpush %v317_v22 }
  0xa3   : > { %v323_v23 = vpop.permute.xlu1 %322  ;;  %v319_v24 = vpop.permute.xlu0 %318 }
  0xa4   : > { %946 = vpush %v319_v24 }
  0xa5   : > { %948 = vpush %v321_v21 }
  0xa6   : > { %950 = vpush %v323_v23 }
  0xa7   : > { %v387_v25 = vpop.permute.xlu1 %386  ;;  %v385_v26 = vpop.permute.xlu0 %384 }
  0xa8   : > { %952 = vpush %v385_v26 }
  0xa9   : > { %954 = vpush %v387_v25 }
  0xab   : > { %v391_v27 = vpop.permute.xlu1 %390  ;;  %v389_v28 = vpop.permute.xlu0 %388 }
  0xac   : > { %956 = vpush %v389_v28 }
  0xad   : > { %958 = vpush %v391_v27 }
  0xae   : > { %960 = vpush %v1331_v5 }
  0xaf   : > { %962 = vpush %v1329_v4  ;;  %v495_v29 = vpop.permute.xlu1 %494  ;;  %v493_v30 = vpop.permute.xlu0 %492 }
  0xb0   : > { %964 = vpush %v1339_v7 }
  0xb1   : > { %966 = vpush %v1337_v6 }
  0xb2   : > { %968 = vpush %v493_v30 }
  0xb3   : > { %970 = vpush %v495_v29  ;;  %v499_v31 = vpop.permute.xlu1 %498  ;;  %v497_v32 = vpop.permute.xlu0 %496 }
  0xb4   : > { %972 = vpush %v497_v32 }
  0xb5   : > { %974 = vpush %v499_v31 }
  0xb7   : > { %v563_v33 = vpop.permute.xlu1 %562  ;;  %v561_v34 = vpop.permute.xlu0 %560 }
  0xb8   : > { %976 = vpush %v561_v34 }
  0xb9   : > { %978 = vpush %v563_v33 }
  0xbb   : > { %v567_v35 = vpop.permute.xlu1 %566  ;;  %v565_v36 = vpop.permute.xlu0 %564 }
  0xbc   : > { %980 = vpush %v565_v36 }
  0xbd   : > { %982 = vpush %v567_v35 }
  0xbe   : > { %984 = vpush %v1355_v9  ;;  %v294_v9 = vstv %s1421_s19 }
  0xbf   : > { %986 = vpush %v1353_v8  ;;  %v671_v37 = vpop.permute.xlu1 %670  ;;  %v669_v38 = vpop.permute.xlu0 %668 }
  0xc0   : > { %988 = vpush %v1359_v11 }
  0xc1   : > { %990 = vpush %v1357_v10 }
  0xc2   : > { %992 = vpush %v669_v38 }
  0xc3   : > { %994 = vpush %v671_v37  ;;  %v675_v39 = vpop.permute.xlu1 %674  ;;  %v673_v40 = vpop.permute.xlu0 %672 }
  0xc4   : > { %996 = vpush %v673_v40 }
  0xc5   : > { %998 = vpush %v675_v39 }
  0xc7   : > { %v739_v41 = vpop.permute.xlu1 %738  ;;  %v737_v42 = vpop.permute.xlu0 %736 }
  0xc8   : > { %1000 = vpush %v737_v42 }
  0xc9   : > { %1002 = vpush %v739_v41 }
  0xcb   : > { %v743_v43 = vpop.permute.xlu1 %742  ;;  %v741_v44 = vpop.permute.xlu0 %740 }
  0xcc   : > { %1004 = vpush %v741_v44 }
  0xcd   : > { %1006 = vpush %v743_v43 }
  0xcf   : > { %v246_v45 = vpop.permute.xlu1 %245  ;;  %v244_v46 = vpop.permute.xlu0 %243 }
  0xd0   : > { %269 = vst.msk [vmem:[#allocation2 + $0x9] sm:$0xff] %vm267_vm5, %v246_v45  ;;  %268 = vst.msk [vmem:[#allocation2 + $0x1] sm:$0xff] %vm267_vm5, %v244_v46 }
  0xd1   : > { %s945_s27 = spop %944 }
  0xd2   : > { %v325_v52 = vstv %s945_s27 }
  0xd3   : > { %v250_v47 = vpop.permute.xlu1 %249  ;;  %v248_v48 = vpop.permute.xlu0 %247 }
  0xd4   : > { %271 = vst.msk [vmem:[#allocation2 + $0x21] sm:$0xff] %vm267_vm5, %v250_v47  ;;  %270 = vst.msk [vmem:[#allocation2 + $0x19] sm:$0xff] %vm267_vm5, %v248_v48 }
  0xd5   : > { %s947_s28 = spop %946 }
  0xd6   : > { %s1431_s29 = spop %948  ;;  %v328_v61 = vstv %s947_s28 }
  0xd7   : > { %v1427_v50 = vld [vmem:[#allocation2] sm:$0xff]  ;;  %v1429_v51 = vld [vmem:[#allocation2 + $0x8] sm:$0xff]  ;;  %v254_v53 = vpop.permute.xlu1 %253  ;;  %v252_v54 = vpop.permute.xlu0 %251  ;;  %s1443_s30 = spop %950  ;;  %v331_v5 = vstv %s1431_s29 }
  0xd8   : > { %v1434_v55 = vmul.f32 %v286_v49, %v1427_v50  ;;  %v1437_v56 = vmul.f32 %v286_v49, %v1429_v51  ;;  %v336_v57 = vmul.f32 %v325_v52, %v1427_v50  ;;  %v337_v58 = vmul.f32 %v325_v52, %v1429_v51  ;;  %273 = vst.msk [vmem:[#allocation2 + $0x39] sm:$0xff] %vm267_vm5, %v254_v53  ;;  %v1477_v8 = vld [vmem:[#allocation2 + $0x1] sm:$0xff]  ;;  %v1480_v10 = vld [vmem:[#allocation2 + $0x9] sm:$0xff] }
  0xd9   : > { %272 = vst.msk [vmem:[#allocation2 + $0x31] sm:$0xff] %vm267_vm5, %v252_v54  ;;  %s1445_s3 = spop %952  ;;  %v334_v34 = vstv %s1443_s30  ;;  %v1562_v45 = vld [vmem:[#allocation2 + $0x2] sm:$0xff]  ;;  %v1564_v46 = vld [vmem:[#allocation2 + $0xa] sm:$0xff] }
  0xda   : > { %354 = vrot.lane.b32.xlu1 %v337_v58, %s1191_s4  ;;  %352 = vrot.lane.b32.xlu0 %v336_v57, %s1191_s4  ;;  %s1456_s5 = spop %954  ;;  %v393_v37 = vstv %s1445_s3 }
  0xdb   : > { %v1449_v59 = vld [vmem:[#allocation2 + $0x18] sm:$0xff]  ;;  %v1451_v60 = vld [vmem:[#allocation2 + $0x20] sm:$0xff]  ;;  %v258_v62 = vpop.permute.xlu1 %257  ;;  %v256_v63 = vpop.permute.xlu0 %255  ;;  %v405_v39 = vmul.f32 %v393_v37, %v1429_v51  ;;  %v404_v40 = vmul.f32 %v393_v37, %v1427_v50  ;;  %v396_v41 = vstv %s1456_s5 }
  0xdc   : > { %v338_v1 = vmul.f32 %v328_v61, %v1449_v59  ;;  %v339_v2 = vmul.f32 %v328_v61, %v1451_v60  ;;  %275 = vst.msk [vmem:[#allocation2 + $0x51] sm:$0xff] %vm267_vm5, %v258_v62  ;;  %274 = vst.msk [vmem:[#allocation2 + $0x49] sm:$0xff] %vm267_vm5, %v256_v63  ;;  %v1463_v3 = vmul.f32 %v290_v0, %v1451_v60  ;;  %v1493_v17 = vld [vmem:[#allocation2 + $0x19] sm:$0xff]  ;;  %v1495_v18 = vld [vmem:[#allocation2 + $0x21] sm:$0xff] }
  0xdd   : > { %s1460_s6 = spop %956  ;;  %v1466_v4 = vmul.f32 %v290_v0, %v1449_v59  ;;  %v407_v42 = vmul.f32 %v396_v41, %v1451_v60  ;;  %v406_v43 = vmul.f32 %v396_v41, %v1449_v59  ;;  %v1573_v50 = vld [vmem:[#allocation2 + $0x1a] sm:$0xff]  ;;  %v1575_v51 = vld [vmem:[#allocation2 + $0x22] sm:$0xff] }
  0xde   : > { %s1468_s21 = spop %958  ;;  %358 = vrot.lane.b32.xlu1 %v339_v2, %s1191_s4  ;;  %356 = vrot.lane.b32.xlu0 %v338_v1, %s1191_s4  ;;  %v399_v44 = vstv %s1460_s6 }
  0xdf   : > { %s961_s7 = spop %960  ;;  %v1484_v13 = vld [vmem:[#allocation2 + $0x39] sm:$0xff] }
  0xe0   : > { %v1473_v6 = vld [vmem:[#allocation2 + $0x30] sm:$0xff]  ;;  %v1475_v7 = vld [vmem:[#allocation2 + $0x38] sm:$0xff]  ;;  %v465_v11 = vstv %s961_s7  ;;  %s963_s15 = spop %962 }
  0xe1   : > { %v1482_v12 = vld [vmem:[#allocation2 + $0x31] sm:$0xff]  ;;  %v341_v14 = vmul.f32 %v331_v5, %v1475_v7  ;;  %v1488_v15 = vmul.f32 %v465_v11, %v1477_v8  ;;  %v1491_v16 = vmul.f32 %v465_v11, %v1480_v10  ;;  %v468_v19 = vstv %s963_s15  ;;  %s965_s16 = spop %964  ;;  %v1587_v59 = vld [vmem:[#allocation2 + $0x3a] sm:$0xff] }
  0xe2   : > { %v340_v20 = vmul.f32 %v331_v5, %v1473_v6  ;;  %v1499_v21 = vmul.f32 %v468_v19, %v1493_v17  ;;  %v1502_v22 = vmul.f32 %v468_v19, %v1495_v18  ;;  %v471_v23 = vstv %s965_s16  ;;  %s967_s18 = spop %966  ;;  %v1585_v58 = vld [vmem:[#allocation2 + $0x32] sm:$0xff] }
  0xe3   : > { %362 = vrot.lane.b32.xlu1 %v341_v14, %s1191_s4  ;;  %v1506_v24 = vmul.f32 %v294_v9, %v1475_v7  ;;  %v1508_v25 = vld [vmem:[#allocation2 + $0x50] sm:$0xff]  ;;  %v1511_v26 = vmul.f32 %v471_v23, %v1482_v12  ;;  %v1514_v27 = vmul.f32 %v471_v23, %v1484_v13  ;;  %v474_v29 = vstv %s967_s18  ;;  %v1522_v31 = vld [vmem:[#allocation2 + $0x48] sm:$0xff]  ;;  %s1529_s19 = spop %968 }
  0xe4   : > { %v1516_v28 = vld [vmem:[#allocation2 + $0x49] sm:$0xff]  ;;  %360 = vrot.lane.b32.xlu0 %v340_v20, %s1191_s4  ;;  %v1520_v30 = vmul.f32 %v294_v9, %v1473_v6  ;;  %v1524_v32 = vld [vmem:[#allocation2 + $0x51] sm:$0xff]  ;;  %s1535_s27 = spop %970  ;;  %v343_v36 = vmul.f32 %v334_v34, %v1508_v25  ;;  %v342_v38 = vmul.f32 %v334_v34, %v1522_v31  ;;  %v409_v53 = vmul.f32 %v399_v44, %v1475_v7 }
  0xe5   : > { %v1527_v33 = vmul.f32 %v474_v29, %v1516_v28  ;;  %v1533_v35 = vmul.f32 %v474_v29, %v1524_v32  ;;  %s1539_s28 = spop %972  ;;  %v408_v61 = vmul.f32 %v399_v44, %v1473_v6  ;;  %v1596_v0 = vld [vmem:[#allocation2 + $0x4a] sm:$0xff]  ;;  %v1598_v1 = vld [vmem:[#allocation2 + $0x52] sm:$0xff]  ;;  %v402_v6 = vstv %s1468_s21 }
  0xe6   : > { %s1543_s29 = spop %974  ;;  %v411_v9 = vmul.f32 %v402_v6, %v1508_v25  ;;  %v410_v11 = vmul.f32 %v402_v6, %v1522_v31  ;;  %v501_v14 = vstv %s1529_s19  ;;  %v504_v23 = vstv %s1535_s27 }
  0xe7   : > { %366 = vrot.lane.b32.xlu1 %v343_v36, %s1191_s4  ;;  %v513_v19 = vmul.f32 %v501_v14, %v1480_v10  ;;  %v512_v20 = vmul.f32 %v501_v14, %v1477_v8  ;;  %v515_v29 = vmul.f32 %v504_v23, %v1495_v18  ;;  %v514_v34 = vmul.f32 %v504_v23, %v1493_v17 }
  0xe8   : > { %364 = vrot.lane.b32.xlu0 %v342_v38, %s1191_s4  ;;  %v507_v36 = vstv %s1539_s28 }
  0xe9   : > { %s1547_s30 = spop %976  ;;  %v517_v37 = vmul.f32 %v507_v36, %v1484_v13  ;;  %v516_v38 = vmul.f32 %v507_v36, %v1482_v12 }
  0xea   : > { %s1551_s7 = spop %978 }
  0xeb   : > { %422 = vrot.lane.b32.xlu1 %v405_v39, %s1192_s8  ;;  %v510_v39 = vstv %s1543_s29 }
  0xec   : > { %420 = vrot.lane.b32.xlu0 %v404_v40, %s1192_s8  ;;  %v519_v40 = vmul.f32 %v510_v39, %v1524_v32  ;;  %v518_v41 = vmul.f32 %v510_v39, %v1516_v28 }
  0xed   : > { %s1555_s3 = spop %980 }
  0xee   : > { %s1558_s15 = spop %982 }
  0xef   : > { %s985_s16 = spop %984  ;;  %426 = vrot.lane.b32.xlu1 %v407_v42, %s1192_s8  ;;  %v569_v42 = vstv %s1547_s30 }
  0xf0   : > { %v641_v47 = vstv %s985_s16  ;;  %s987_s5 = spop %986  ;;  %424 = vrot.lane.b32.xlu0 %v406_v43, %s1192_s8  ;;  %v581_v43 = vmul.f32 %v569_v42, %v1480_v10  ;;  %v580_v44 = vmul.f32 %v569_v42, %v1477_v8 }
  0xf1   : > { %v1568_v48 = vmul.f32 %v641_v47, %v1562_v45  ;;  %v1571_v49 = vmul.f32 %v641_v47, %v1564_v46  ;;  %v644_v52 = vstv %s987_s5  ;;  %s989_s6 = spop %988  ;;  %v572_v47 = vstv %s1551_s7 }
  0xf2   : > { %v1580_v54 = vmul.f32 %v644_v52, %v1573_v50  ;;  %v1583_v57 = vmul.f32 %v644_v52, %v1575_v51  ;;  %v647_v60 = vstv %s989_s6  ;;  %s991_s18 = spop %990  ;;  %v583_v52 = vmul.f32 %v572_v47, %v1495_v18  ;;  %s1195_s6 = smov [#allocation6]  }
  0xf3   : > { %v1591_v62 = vmul.f32 %v647_v60, %v1585_v58  ;;  %v1594_v63 = vmul.f32 %v647_v60, %v1587_v59  ;;  %v650_v2 = vstv %s991_s18  ;;  %430 = vrot.lane.b32.xlu1 %v409_v53, %s1192_s8  ;;  %v582_v53 = vmul.f32 %v572_v47, %v1493_v17  ;;  %s993_s21 = spop %992  ;;  %s1110_s18 = sshll.u32 %s1195_s6, 4  ;;  %s1111_s18 = int_to_ptr.vmem [resolvable:$false] %s1110_s18 }
  0xf4   : > { %v1601_v5 = vmul.f32 %v650_v2, %v1596_v0  ;;  %v1604_v7 = vmul.f32 %v650_v2, %v1598_v1  ;;  %428 = vrot.lane.b32.xlu0 %v408_v61, %s1192_s8  ;;  %v575_v60 = vstv %s1555_s3  ;;  %v578_v2 = vstv %s1558_s15  ;;  %s995_s19 = spop %994 }
  0xf5   : > { %v585_v61 = vmul.f32 %v575_v60, %v1484_v13  ;;  %v584_v10 = vmul.f32 %v575_v60, %v1482_v12  ;;  %v587_v8 = vmul.f32 %v578_v2, %v1524_v32  ;;  %v586_v18 = vmul.f32 %v578_v2, %v1516_v28  ;;  %s997_s27 = spop %996 }
  0xf6   : > { %v677_v17 = vstv %s993_s21  ;;  %v680_v6 = vstv %s995_s19  ;;  %s999_s28 = spop %998  ;;  %s1112_s21 = scalar_lea.vmem %s1111_s18, 2048 }
  0xf7   : > { %434 = vrot.lane.b32.xlu1 %v411_v9, %s1192_s8  ;;  %v689_v13 = vmul.f32 %v677_v17, %v1564_v46  ;;  %v688_v12 = vmul.f32 %v677_v17, %v1562_v45  ;;  %v691_v32 = vmul.f32 %v680_v6, %v1575_v51  ;;  %v690_v28 = vmul.f32 %v680_v6, %v1573_v50 }
  0xf8   : > { %432 = vrot.lane.b32.xlu0 %v410_v11, %s1192_s8  ;;  %v683_v9 = vstv %s997_s27 }
  0xf9   : > { %v693_v11 = vmul.f32 %v683_v9, %v1587_v59  ;;  %v692_v14 = vmul.f32 %v683_v9, %v1585_v58  ;;  %s1001_s29 = spop %1000 }
  0xfa   : > { %s1003_s30 = spop %1002 }
  0xfb   : > { %530 = vrot.lane.b32.xlu1 %v513_v19, %s1191_s4  ;;  %v686_v19 = vstv %s999_s28 }
  0xfc   : > { %528 = vrot.lane.b32.xlu0 %v512_v20, %s1191_s4  ;;  %v695_v20 = vmul.f32 %v686_v19, %v1598_v1  ;;  %v694_v23 = vmul.f32 %v686_v19, %v1596_v0 }
  0xfd   : > { %s1005_s7 = spop %1004 }
  0xfe   : > { %s1007_s3 = spop %1006 }
  0xff   : > { %534 = vrot.lane.b32.xlu1 %v515_v29, %s1191_s4  ;;  %v745_v29 = vstv %s1001_s29 }
 0x100   : > { %532 = vrot.lane.b32.xlu0 %v514_v34, %s1191_s4  ;;  %v757_v34 = vmul.f32 %v745_v29, %v1564_v46  ;;  %v756_v36 = vmul.f32 %v745_v29, %v1562_v45 }
 0x103   : > { %538 = vrot.lane.b32.xlu1 %v517_v37, %s1191_s4  ;;  %v748_v37 = vstv %s1003_s30 }
 0x104   : > { %536 = vrot.lane.b32.xlu0 %v516_v38, %s1191_s4  ;;  %v759_v38 = vmul.f32 %v748_v37, %v1575_v51  ;;  %v758_v39 = vmul.f32 %v748_v37, %v1573_v50 }
 0x107   : > { %542 = vrot.lane.b32.xlu1 %v519_v40, %s1191_s4  ;;  %v751_v40 = vstv %s1005_s7 }
 0x108   : > { %540 = vrot.lane.b32.xlu0 %v518_v41, %s1191_s4  ;;  %v761_v46 = vmul.f32 %v751_v40, %v1587_v59  ;;  %v760_v45 = vmul.f32 %v751_v40, %v1585_v58  ;;  %v754_v41 = vstv %s1007_s3 }
 0x109   : > { %v763_v42 = vmul.f32 %v754_v41, %v1598_v1  ;;  %v762_v50 = vmul.f32 %v754_v41, %v1596_v0 }
 0x10b   : > { %598 = vrot.lane.b32.xlu1 %v581_v43, %s1192_s8 }
 0x10c   : > { %596 = vrot.lane.b32.xlu0 %v580_v44, %s1192_s8 }
 0x10f   : > { %602 = vrot.lane.b32.xlu1 %v583_v52, %s1192_s8 }
 0x110   : > { %600 = vrot.lane.b32.xlu0 %v582_v53, %s1192_s8 }
 0x113   : > { %606 = vrot.lane.b32.xlu1 %v585_v61, %s1192_s8 }
 0x114   : > { %604 = vrot.lane.b32.xlu0 %v584_v10, %s1192_s8  ;;  %v298_v10 = vstv %s1423_s26 }
 0x115   : > { %v307_v2 = vmul.f32 %v298_v10, %v1508_v25 }
 0x117   : > { %610 = vrot.lane.b32.xlu1 %v587_v8, %s1192_s8 }
 0x118   : > { %608 = vrot.lane.b32.xlu0 %v586_v18, %s1192_s8 }
 0x11b   : > { %706 = vrot.lane.b32.xlu1 %v689_v13, %s1191_s4 }
 0x11c   : > { %704 = vrot.lane.b32.xlu0 %v688_v12, %s1191_s4 }
 0x11f   : > { %710 = vrot.lane.b32.xlu1 %v691_v32, %s1191_s4 }
 0x120   : > { %708 = vrot.lane.b32.xlu0 %v690_v28, %s1191_s4 }
 0x123   : > { %714 = vrot.lane.b32.xlu1 %v693_v11, %s1191_s4 }
 0x124   : > { %712 = vrot.lane.b32.xlu0 %v692_v14, %s1191_s4 }
 0x127   : > { %718 = vrot.lane.b32.xlu1 %v695_v20, %s1191_s4 }
 0x128   : > { %716 = vrot.lane.b32.xlu0 %v694_v23, %s1191_s4  ;;  %s180_s4 = scalar_lea.vmem [#allocation6], %s927_s25  ;;  %s935_s25 = sshll.u32 %s1178_s12, 10 }
 0x129   : > { %s1722_s16 = scalar_lea.hbm %s1776_s2, %s935_s25  ;;  %s814_s12 = scalar_lea.sflag [#allocation5], %s1297_s20 }
 0x12b   : > { %774 = vrot.lane.b32.xlu1 %v757_v34, %s1192_s8 }
 0x12c   : > { %772 = vrot.lane.b32.xlu0 %v756_v36, %s1192_s8 }
 0x12f   : > { %778 = vrot.lane.b32.xlu1 %v759_v38, %s1192_s8 }
 0x130   : > { %776 = vrot.lane.b32.xlu0 %v758_v39, %s1192_s8 }
 0x133   : > { %782 = vrot.lane.b32.xlu1 %v761_v46, %s1192_s8 }
 0x134   : > { %780 = vrot.lane.b32.xlu0 %v760_v45, %s1192_s8 }
 0x137   : > { %786 = vrot.lane.b32.xlu1 %v763_v42, %s1192_s8 }
 0x138   : > { %784 = vrot.lane.b32.xlu0 %v762_v50, %s1192_s8  ;;  %s830_s8 = sshll.u32 %s180_s4, 4  ;;  %s1724_s8 = int_to_ptr.vmem [resolvable:$true] %s830_s8 }
 0x139   : > { %s1106_s5 = scalar_lea.vmem %s1724_s8, 1024  ;;  %p1113_p1 = scmp.lt.s32.totalorder %s1724_s8, %s1111_s18 }
 0x13a   : > { %p1107_p8 = scmp.ne.s32.totalorder %s1724_s8, %s1106_s5  ;;  %p1114_p3 = scmp.lt.s32.totalorder %s1112_s21, %s1106_s5 }
 0x13c   : > { %p1108_p12 = pnand %p1107_p8, %p1264_p9  ;;  %p1115_p5 = por %p1114_p3, %p1113_p1 }
 0x13e   : > { %p1109_p0 = pneg %p1108_p12 }
 0x140   : > { %p1116_p6 = pnand %p1115_p5, %p1109_p0 }
 0x14c   : > { %v355_v51 = vpop.permute.xlu1 %354  ;;  %v353_v43 = vpop.permute.xlu0 %352 }
 0x14d   : > { %v377_v59 = vadd.f32 %v355_v51, %v1437_v56  ;;  %v376_v58 = vadd.f32 %v353_v43, %v1434_v55  ;;  %v306_v56 = vmul.f32 %v298_v10, %v1522_v31 }
 0x150   : > { %v359_v44 = vpop.permute.xlu1 %358  ;;  %v357_v47 = vpop.permute.xlu0 %356 }
 0x151   : > { %v379_v52 = vadd.f32 %v359_v44, %v1463_v3  ;;  %v378_v53 = vadd.f32 %v357_v47, %v1466_v4 }
 0x155   : > { %v363_v1 = vpop.permute.xlu1 %362 }
 0x156   : > { %v381_v60 = vadd.f32 %v363_v1, %v1506_v24  ;;  %v361_v0 = vpop.permute.xlu0 %360 }
 0x157   : > { %v380_v61 = vadd.f32 %v361_v0, %v1520_v30 }
 0x159   : > { %v367_v8 = vpop.permute.xlu1 %366 }
 0x15a   : > { %v383_v18 = vadd.f32 %v367_v8, %v307_v2  ;;  %v365_v55 = vpop.permute.xlu0 %364 }
 0x15b   : > { %v382_v17 = vadd.f32 %v365_v55, %v306_v56 }
 0x15d   : > { %v423_v13 = vpop.permute.xlu1 %422 }
 0x15e   : > { %v445_v12 = vadd.f32 %v423_v13, %v377_v59  ;;  %v421_v3 = vpop.permute.xlu0 %420 }
 0x15f   : > { %v444_v6 = vadd.f32 %v421_v3, %v376_v58 }
 0x160   : > { %v485_v4 = vadd.f32 %v1491_v16, %v445_v12 }
 0x161   : > { %v427_v32 = vpop.permute.xlu1 %426  ;;  %v484_v24 = vadd.f32 %v1488_v15, %v444_v6 }
 0x162   : > { %v447_v28 = vadd.f32 %v427_v32, %v379_v52  ;;  %v425_v30 = vpop.permute.xlu0 %424 }
 0x163   : > { %v446_v9 = vadd.f32 %v425_v30, %v378_v53 }
 0x164   : > { %v487_v25 = vadd.f32 %v1502_v22, %v447_v28 }
 0x165   : > { %v431_v11 = vpop.permute.xlu1 %430  ;;  %v486_v31 = vadd.f32 %v1499_v21, %v446_v9 }
 0x166   : > { %v449_v14 = vadd.f32 %v431_v11, %v381_v60  ;;  %v429_v19 = vpop.permute.xlu0 %428 }
 0x167   : > { %v448_v20 = vadd.f32 %v429_v19, %v380_v61 }
 0x168   : > { %v489_v23 = vadd.f32 %v1514_v27, %v449_v14 }
 0x169   : > { %v435_v29 = vpop.permute.xlu1 %434  ;;  %v488_v34 = vadd.f32 %v1511_v26, %v448_v20 }
 0x16a   : > { %v451_v16 = vadd.f32 %v435_v29, %v383_v18  ;;  %v433_v36 = vpop.permute.xlu0 %432 }
 0x16b   : > { %v450_v37 = vadd.f32 %v433_v36, %v382_v17 }
 0x16c   : > { %v491_v15 = vadd.f32 %v1533_v35, %v451_v16 }
 0x16d   : > { %v531_v38 = vpop.permute.xlu1 %530  ;;  %v490_v39 = vadd.f32 %v1527_v33, %v450_v37 }
 0x16e   : > { %v529_v22 = vpop.permute.xlu0 %528  ;;  %v553_v50 = vadd.f32 %v531_v38, %v485_v4 }
 0x16f   : > { %v552_v27 = vadd.f32 %v529_v22, %v484_v24 }
 0x171   : > { %v535_v40 = vpop.permute.xlu1 %534 }
 0x172   : > { %v533_v46 = vpop.permute.xlu0 %532  ;;  %v555_v58 = vadd.f32 %v535_v40, %v487_v25 }
 0x173   : > { %v554_v35 = vadd.f32 %v533_v46, %v486_v31 }
 0x175   : > { %v539_v21 = vpop.permute.xlu1 %538 }
 0x176   : > { %v537_v45 = vpop.permute.xlu0 %536  ;;  %v557_v60 = vadd.f32 %v539_v21, %v489_v23 }
 0x177   : > { %v556_v61 = vadd.f32 %v537_v45, %v488_v34 }
 0x179   : > { %v543_v41 = vpop.permute.xlu1 %542 }
 0x17a   : > { %v541_v42 = vpop.permute.xlu0 %540  ;;  %v559_v55 = vadd.f32 %v543_v41, %v491_v15 }
 0x17b   : > { %v558_v17 = vadd.f32 %v541_v42, %v490_v39 }
 0x17d   : > { %v599_v51 = vpop.permute.xlu1 %598 }
 0x17e   : > { %v621_v43 = vadd.f32 %v599_v51, %v553_v50  ;;  %v597_v26 = vpop.permute.xlu0 %596 }
 0x17f   : > { %v620_v59 = vadd.f32 %v597_v26, %v552_v27 }
 0x180   : > { %v661_v44 = vadd.f32 %v1571_v49, %v621_v43 }
 0x181   : > { %v603_v47 = vpop.permute.xlu1 %602  ;;  %v660_v33 = vadd.f32 %v1568_v48, %v620_v59 }
 0x182   : > { %v623_v52 = vadd.f32 %v603_v47, %v555_v58  ;;  %v601_v53 = vpop.permute.xlu0 %600 }
 0x183   : > { %v622_v1 = vadd.f32 %v601_v53, %v554_v35 }
 0x184   : > { %v663_v0 = vadd.f32 %v1583_v57, %v623_v52 }
 0x185   : > { %v607_v10 = vpop.permute.xlu1 %606  ;;  %v662_v2 = vadd.f32 %v1580_v54, %v622_v1 }
 0x186   : > { %v625_v8 = vadd.f32 %v607_v10, %v557_v60  ;;  %v605_v56 = vpop.permute.xlu0 %604 }
 0x187   : > { %v624_v18 = vadd.f32 %v605_v56, %v556_v61 }
 0x188   : > { %v665_v49 = vadd.f32 %v1594_v63, %v625_v8 }
 0x189   : > { %v611_v13 = vpop.permute.xlu1 %610  ;;  %v664_v48 = vadd.f32 %v1591_v62, %v624_v18 }
 0x18a   : > { %v627_v12 = vadd.f32 %v611_v13, %v559_v55  ;;  %v609_v3 = vpop.permute.xlu0 %608 }
 0x18b   : > { %v626_v6 = vadd.f32 %v609_v3, %v558_v17 }
 0x18c   : > { %v667_v4 = vadd.f32 %v1604_v7, %v627_v12 }
 0x18d   : > { %v707_v57 = vpop.permute.xlu1 %706  ;;  %v666_v32 = vadd.f32 %v1601_v5, %v626_v6 }
 0x18e   : > { %v705_v54 = vpop.permute.xlu0 %704  ;;  %v729_v11 = vadd.f32 %v707_v57, %v661_v44 }
 0x18f   : > { %v728_v31 = vadd.f32 %v705_v54, %v660_v33 }
 0x191   : > { %v711_v24 = vpop.permute.xlu1 %710 }
 0x192   : > { %v709_v28 = vpop.permute.xlu0 %708  ;;  %v731_v23 = vadd.f32 %v711_v24, %v663_v0 }
 0x193   : > { %v730_v5 = vadd.f32 %v709_v28, %v662_v2 }
 0x195   : > { %v715_v30 = vpop.permute.xlu1 %714 }
 0x196   : > { %v713_v9 = vpop.permute.xlu0 %712  ;;  %v733_v36 = vadd.f32 %v715_v30, %v665_v49 }
 0x197   : > { %v732_v37 = vadd.f32 %v713_v9, %v664_v48 }
 0x199   : > { %v719_v25 = vpop.permute.xlu1 %718 }
 0x19a   : > { %v717_v63 = vpop.permute.xlu0 %716  ;;  %v735_v40 = vadd.f32 %v719_v25, %v667_v4 }
 0x19b   : > { %v734_v46 = vadd.f32 %v717_v63, %v666_v32 }
 0x19d   : > { %v775_v62 = vpop.permute.xlu1 %774 }
 0x19e   : > { %v797_v14 = vadd.f32 %v775_v62, %v729_v11  ;;  %v773_v19 = vpop.permute.xlu0 %772 }
 0x19f   : > { %v796_v20 = vadd.f32 %v773_v19, %v728_v31 }
 0x1a0   : > { %806 = vst.msk [vmem:[%s180_s4 + $0x8] sm:$0xff] %vm804_vm6, %v797_v14 }
 0x1a1   : > { %805 = vst.msk [vmem:[%s180_s4] sm:$0xff] %vm804_vm6, %v796_v20  ;;  %v779_v7 = vpop.permute.xlu1 %778 }
 0x1a2   : > { %v799_v29 = vadd.f32 %v779_v7, %v731_v23  ;;  %v777_v34 = vpop.permute.xlu0 %776 }
 0x1a3   : > { %v798_v16 = vadd.f32 %v777_v34, %v730_v5 }
 0x1a4   : > { %808 = vst.msk [vmem:[%s180_s4 + $0x18] sm:$0xff] %vm804_vm6, %v799_v29 }
 0x1a5   : > { %807 = vst.msk [vmem:[%s180_s4 + $0x10] sm:$0xff] %vm804_vm6, %v798_v16  ;;  %v783_v15 = vpop.permute.xlu1 %782 }
 0x1a6   : > { %v801_v38 = vadd.f32 %v783_v15, %v733_v36  ;;  %v781_v39 = vpop.permute.xlu0 %780 }
 0x1a7   : > { %v800_v22 = vadd.f32 %v781_v39, %v732_v37 }
 0x1a8   : > { %810 = vst.msk [vmem:[%s180_s4 + $0x28] sm:$0xff] %vm804_vm6, %v801_v38 }
 0x1a9   : > { %809 = vst.msk [vmem:[%s180_s4 + $0x20] sm:$0xff] %vm804_vm6, %v800_v22  ;;  %v787_v21 = vpop.permute.xlu1 %786 }
 0x1aa   : > { %v803_v45 = vadd.f32 %v787_v21, %v735_v40  ;;  %v785_v41 = vpop.permute.xlu0 %784 }
 0x1ab   : > { %v802_v42 = vadd.f32 %v785_v41, %v734_v46 }
 0x1ac   : > { %812 = vst.msk [vmem:[%s180_s4 + $0x38] sm:$0xff] %vm804_vm6, %v803_v45 }
 0x1ad   : > { %811 = vst.msk [vmem:[%s180_s4 + $0x30] sm:$0xff] %vm804_vm6, %v802_v42 }
 0x1ae   : > { %1119 = shalt.err (!%p1116_p6)
}
 0x1af   : > { %s1120_s19 = scalar_lea.hbm %s1722_s16, 1024  ;;  %s1124_s29 = scalar_lea.hbm %s1776_s2, 2048 }
 0x1b0   : > { %p1121_p7 = scmp.ne.s32.totalorder %s1722_s16, %s1120_s19  ;;  %p1125_p13 = scmp.lt.s32.totalorder %s1722_s16, %s1776_s2 }
 0x1b1   : > { %p1126_p2 = scmp.lt.s32.totalorder %s1124_s29, %s1120_s19 }
 0x1b2   : > { %p1122_p10 = pnand %p1121_p7, %p1264_p9 }
 0x1b3   : > { %p1127_p8 = por %p1126_p2, %p1125_p13 }
 0x1b4   : > { %p1123_p4 = pneg %p1122_p10 }
 0x1b6   : > { %p1128_p12 = pnand %p1127_p8, %p1123_p4 }
 0x1b8   : > { %1131 = shalt.err (!%p1128_p12)
}
 0x1b9   : > { %s1196_s3 = smov 128   ;;  %s1197_s4 = smov 8  }
 0x1ba   : > { %1010 = dma.vmem_to_hbm [thread:$0]  (%p1264_p9), %s1724_s8, 1024, %s1722_s16, %s814_s12, %s1196_s3, %s1196_s3, %s1197_s4  }
 0x1bb PF: > { %s845_s25 = sand.u32 1, %s1166_s9   ;;  %p1782_p0 = scmp.ge.s32.totalorder %s1186_s14, 2 }
 0x1bc   : > { %s846_s26 = scalar_lea.sflag [#allocation5], %s845_s25 }
 0x1bd   : > { %p1017_p1 = pnand %p1782_p0, %p1271_p11 }
 0x1bf   : > { %p1018_p3 = pneg %p1017_p1 }
 0x1c1   : > { %1161 = dma.done.wait (%p1018_p3), %s846_s26, 1024  }
 0x1c2   : > { %1163 = vsyncadd (%p1018_p3), %s846_s26, 4294966272  ;;  %s18_s14 = sadd.s32 1, %s1186_s14   ;;  %s1783_s9 = smov %s1170_s10 }
 0x1c3   : > { %p15_p5 = scmp.ge.s32.totalorder %s18_s14, 4   ;;  %s1784_s10 = smov %s1174_s11 }
 0x1c4   : > { %s1785_s11 = smov %s1269_s23  ;;  %s1786_s12 = smov %s1182_s13 }
 0x1c5   : > { %s1787_s13 = smov %s1789_s17  ;;  %17 = sbr.rel (!%p15_p5) target bundleno = 6 (0x6), region = 74 }
 0x1ca   :  { %851 = vsyncpa [#allocation4], 1 }
 0x1cb   :  { %853 = vsyncpa [#allocation4 + $0x1], 1 }
 0x1cc   :  { %854 = vsyncpa [#allocation5], 1 }
 0x1cd   :  { %856 = vsyncpa [#allocation5 + $0x1], 1 }

</bundles_post_ra>
